<compile_context>
chip_gen: v7x
topology: tpu7x:2x2x1
jax: 0.10.0
libtpu: 0.0.40
codegen_flags: <defaults>
</compile_context>

<pallas_src>
import functools

import jax
import jax.numpy as jnp
from jax.experimental import pallas as pl
from jax.experimental.pallas import tpu as pltpu


def _mha_kernel(q_ref, k_ref, v_ref, bias_ref,
                wqkv_ref, wo_ref, g_ref, b_ref,
                o_ref, *, n_heads, n_embed, inv_scale, eps):
    tq = q_ref.shape[1]
    s = k_ref.shape[1]
    he = n_heads * n_embed

    q = q_ref[0]                                    # (TQ, M) f32 -- residual
    q_bf = q.astype(jnp.bfloat16)
    k_bf = k_ref[0].astype(jnp.bfloat16)            # (S, M)
    v_bf = v_ref[0].astype(jnp.bfloat16)            # (S, M)

    wqkv = wqkv_ref[...]                            # (M, 3*HE) bf16
    wo = wo_ref[...]                                # (HE, M)   bf16

    # Input projections: bf16 MXU operands, f32 accumulation.
    qp = jnp.dot(q_bf, wqkv[:, :he], preferred_element_type=jnp.float32)
    kp = jnp.dot(k_bf, wqkv[:, he:2 * he], preferred_element_type=jnp.float32)
    vp = jnp.dot(v_bf, wqkv[:, 2 * he:], preferred_element_type=jnp.float32)

    # Fold 1/scale into qp once instead of scaling every (TQ, S) score tile.
    qp = (qp * inv_scale).astype(jnp.bfloat16)      # (TQ, HE)
    kp = kp.astype(jnp.bfloat16)                    # (S, HE)
    vp = vp.astype(jnp.bfloat16)                    # (S, HE)

    # Key-padding mask as additive bias, hoisted out of the head loop.
    bias = jnp.broadcast_to(bias_ref[0], (tq, s))   # (TQ, S) f32: 0 keep, -1e30 drop

    # Per-head attention; accumulate the output projection per head into
    # (TQ, M) f32 (residual folded into the initial value) -- no concatenate,
    # no extra (TQ, HE) context buffer.
    x = q
    for h in range(n_heads):
        lo = h * n_embed
        hi = lo + n_embed
        qh = qp[:, lo:hi]                           # (TQ, E) bf16
        kh = kp[:, lo:hi]                           # (S,  E) bf16
        vh = vp[:, lo:hi]                           # (S,  E) bf16

        scores = jnp.dot(qh, kh.T,
                         preferred_element_type=jnp.float32) + bias   # (TQ, S) f32
        scores = scores - jnp.max(scores, axis=-1, keepdims=True)
        p = jnp.exp(scores)
        p = p * pl.reciprocal(jnp.sum(p, axis=-1, keepdims=True), approx=True)

        ctx = jnp.dot(p.astype(jnp.bfloat16), vh,
                      preferred_element_type=jnp.float32)              # (TQ, E)
        x = x + jnp.dot(ctx.astype(jnp.bfloat16), wo[lo:hi, :],
                        preferred_element_type=jnp.float32)            # (TQ, M)

    # LayerNorm over the model dim (biased variance), all in f32.
    mu = jnp.mean(x, axis=-1, keepdims=True)
    var = jnp.mean((x - mu) ** 2, axis=-1, keepdims=True)
    y = (x - mu) * jax.lax.rsqrt(var + eps)
    y = y * g_ref[...] + b_ref[...]                 # (1, M) broadcast
    o_ref[0] = y.astype(o_ref.dtype)


def _pick_query_tile(seq_len):
    """Largest query tile <= 256 that divides S (falls back to full S)."""
    if seq_len <= 256:
        return seq_len
    for t in (256, 128, 64, 32, 16, 8):
        if seq_len % t == 0:
            return t
    return seq_len


def multi_head_attention(q, k, v, mask, params, *, n_heads, n_embed, eps=1e-5):
    """q,k,v: (B,S,M) float32; mask: (B,S) bool; params: dict of f32 weights."""
    B, S, M = q.shape
    HE = n_heads * n_embed
    inv_scale = 1.0 / (float(n_embed) ** 0.5)

    # PyTorch Linear stores (out, in) and applies x @ W.T; pre-transpose, fuse
    # the three projection weights into one operand, and pre-cast to bf16
    # (MXU-native on v5e/v6e/v7x; accumulation stays f32 in-kernel).
    wqkv = jnp.concatenate(
        [params["wq"].T, params["wk"].T, params["wv"].T], axis=1
    ).astype(jnp.bfloat16)                                     # (M, 3*HE)
    wo = params["wo"].T.astype(jnp.bfloat16)                   # (HE, M)
    gamma = params["ln_w"].reshape(1, M).astype(jnp.float32)
    beta = params["ln_b"].reshape(1, M).astype(jnp.float32)

    # Key mask -> additive bias (0 keep / -1e30 drop). Finite value avoids the
    # exp(-inf - -inf) = NaN hazard on fully-masked rows.
    bias = jnp.where(mask, 0.0, -1e30).astype(jnp.float32).reshape(B, 1, S)

    TQ = _pick_query_tile(S)
    grid = (B, S // TQ)

    kernel = functools.partial(_mha_kernel, n_heads=n_heads, n_embed=n_embed,
                               inv_scale=inv_scale, eps=eps)

    # Grid-invariant operands: single-buffered to save VMEM (v7x: 64 MiB/TC).
    def w_spec(shape):
        return pl.BlockSpec(shape, lambda b, i: (0, 0),
                            pipeline_mode=pl.Buffered(1))

    return pl.pallas_call(
        kernel,
        out_shape=jax.ShapeDtypeStruct((B, S, M), q.dtype),
        grid=grid,
        in_specs=[
            pl.BlockSpec((1, TQ, M), lambda b, i: (b, i, 0)),   # q (query-tiled)
            pl.BlockSpec((1, S, M), lambda b, i: (b, 0, 0)),    # k (whole seq)
            pl.BlockSpec((1, S, M), lambda b, i: (b, 0, 0)),    # v (whole seq)
            pl.BlockSpec((1, 1, S), lambda b, i: (b, 0, 0)),    # additive mask bias
            w_spec((M, 3 * HE)),                                # fused wq|wk|wv ^T
            w_spec((HE, M)),                                    # wo^T
            w_spec((1, M)),                                     # LayerNorm gamma
            w_spec((1, M)),                                     # LayerNorm beta
        ],
        out_specs=pl.BlockSpec((1, TQ, M), lambda b, i: (b, i, 0)),
        compiler_params=pltpu.CompilerParams(
            dimension_semantics=("parallel", "parallel"),
            vmem_limit_bytes=48 * 1024 * 1024),                 # < v7x 64 MiB/TC
    )(q, k, v, bias, wqkv, wo, gamma, beta)


def _reference(q, k, v, mask, params, *, n_heads, n_embed, eps=1e-5):
    """Pure-JAX f32 replica of the PyTorch forward (eval mode)."""
    B, S, M = q.shape
    scale = float(n_embed) ** 0.5
    qp = (q @ params["wq"].T).reshape(B, S, n_heads, n_embed)
    kp = (k @ params["wk"].T).reshape(B, S, n_heads, n_embed)
    vp = (v @ params["wv"].T).reshape(B, S, n_heads, n_embed)
    qp = jnp.transpose(qp, (2, 0, 1, 3)).reshape(-1, S, n_embed)
    kp = jnp.transpose(kp, (2, 0, 1, 3)).reshape(-1, S, n_embed)
    vp = jnp.transpose(vp, (2, 0, 1, 3)).reshape(-1, S, n_embed)
    m = jnp.tile(mask, (n_heads, 1))                         # (H*B, S)
    attn = qp @ jnp.swapaxes(kp, -1, -2) / scale
    attn = jnp.where(m[:, None, :], attn, -jnp.inf)
    attn = jax.nn.softmax(attn, axis=-1)
    x = attn @ vp
    x = x.reshape(n_heads, B, S, n_embed)
    x = jnp.transpose(x, (1, 2, 0, 3)).reshape(B, S, -1)
    x = x @ params["wo"].T
    x = x + q
    mu = x.mean(-1, keepdims=True)
    var = ((x - mu) ** 2).mean(-1, keepdims=True)
    return (x - mu) / jnp.sqrt(var + eps) * params["ln_w"] + params["ln_b"]


def _orthogonal(key, shape):
    a = jax.random.normal(key, (max(shape), max(shape)), jnp.float32)
    qmat, _ = jnp.linalg.qr(a)
    return qmat[: shape[0], : shape[1]]


if __name__ == "__main__":
    B, S = 2, 8
    n_heads, n_model, n_embed = 4, 32, 16
    HE = n_heads * n_embed

    key = jax.random.PRNGKey(0)
    kq, kk, kv, k1, k2, k3, k4 = jax.random.split(key, 7)

    q = jax.random.normal(kq, (B, S, n_model), jnp.float32)
    k = jax.random.normal(kk, (B, S, n_model), jnp.float32)
    v = jax.random.normal(kv, (B, S, n_model), jnp.float32)
    # Key-padding mask: at least one valid key per batch row.
    lengths = jnp.array([S, S - 2])
    mask = jnp.arange(S)[None, :] < lengths[:, None]          # (B, S) bool

    params = {
        "wq": _orthogonal(k1, (HE, n_model)),                 # orthogonal init (reset_parameters)
        "wk": _orthogonal(k2, (HE, n_model)),
        "wv": _orthogonal(k3, (HE, n_model)),
        "wo": jax.random.normal(k4, (n_model, HE), jnp.float32) * (1.0 / HE ** 0.5),
        "ln_w": jnp.ones((n_model,), jnp.float32),
        "ln_b": jnp.zeros((n_model,), jnp.float32),
    }

    out = multi_head_attention(q, k, v, mask, params,
                               n_heads=n_heads, n_embed=n_embed)
    out = jax.block_until_ready(out)

    ref = _reference(q, k, v, mask, params, n_heads=n_heads, n_embed=n_embed)
    assert out.shape == (B, S, n_model)
    # Tolerance accounts for bf16 MXU operands (f32 accumulation) vs f32 reference.
    assert jnp.allclose(out, ref, atol=1e-1, rtol=1e-1), "mismatch vs reference"
    print("KERNEL_OK")
</pallas_src>

<mosaic_0001>
module attributes {stable_mosaic.version = 11 : i64} {
  func.func @_mha_kernel(%arg0: i32, %arg1: i32, %arg2: memref<1x8x32xf32, #tpu.memory_space<vmem>>, %arg3: memref<1x8x32xf32, #tpu.memory_space<vmem>>, %arg4: memref<1x8x32xf32, #tpu.memory_space<vmem>>, %arg5: memref<1x1x8xf32, #tpu.memory_space<vmem>>, %arg6: memref<32x192xbf16, #tpu.memory_space<vmem>>, %arg7: memref<64x32xbf16, #tpu.memory_space<vmem>>, %arg8: memref<1x32xf32, #tpu.memory_space<vmem>>, %arg9: memref<1x32xf32, #tpu.memory_space<vmem>>, %arg10: memref<1x8x32xf32, #tpu.memory_space<vmem>>) attributes {dimension_semantics = [#tpu.dimension_semantics<parallel>, #tpu.dimension_semantics<parallel>], iteration_bounds = array<i64: 2, 1>, scalar_prefetch = 0 : i64, scratch_operands = 0 : i64, tpu.core_type = #tpu.core_type<tc>, window_params = [{transform_indices = @transform_0, window_bounds = array<i64: 1, 8, 32>}, {transform_indices = @transform_1, window_bounds = array<i64: 1, 8, 32>}, {transform_indices = @transform_2, window_bounds = array<i64: 1, 8, 32>}, {transform_indices = @transform_3, window_bounds = array<i64: 1, 1, 8>}, {pipeline_mode = #tpu.pipeline_mode<synchronous>, transform_indices = @transform_4, window_bounds = array<i64: 32, 192>}, {pipeline_mode = #tpu.pipeline_mode<synchronous>, transform_indices = @transform_5, window_bounds = array<i64: 64, 32>}, {pipeline_mode = #tpu.pipeline_mode<synchronous>, transform_indices = @transform_6, window_bounds = array<i64: 1, 32>}, {pipeline_mode = #tpu.pipeline_mode<synchronous>, transform_indices = @transform_7, window_bounds = array<i64: 1, 32>}, {transform_indices = @transform_8, window_bounds = array<i64: 1, 8, 32>}]} {
    %c0 = arith.constant 0 : index
    %c0_0 = arith.constant 0 : index
    %c0_1 = arith.constant 0 : index
    %0 = vector.load %arg2[%c0, %c0_0, %c0_1] : memref<1x8x32xf32, #tpu.memory_space<vmem>>, vector<1x8x32xf32>
    %1 = vector.shape_cast %0 : vector<1x8x32xf32> to vector<8x32xf32>
    %2 = arith.truncf %1 : vector<8x32xf32> to vector<8x32xbf16>
    %c0_2 = arith.constant 0 : index
    %c0_3 = arith.constant 0 : index
    %c0_4 = arith.constant 0 : index
    %3 = vector.load %arg3[%c0_2, %c0_3, %c0_4] : memref<1x8x32xf32, #tpu.memory_space<vmem>>, vector<1x8x32xf32>
    %4 = vector.shape_cast %3 : vector<1x8x32xf32> to vector<8x32xf32>
    %5 = arith.truncf %4 : vector<8x32xf32> to vector<8x32xbf16>
    %c0_5 = arith.constant 0 : index
    %c0_6 = arith.constant 0 : index
    %c0_7 = arith.constant 0 : index
    %6 = vector.load %arg4[%c0_5, %c0_6, %c0_7] : memref<1x8x32xf32, #tpu.memory_space<vmem>>, vector<1x8x32xf32>
    %7 = vector.shape_cast %6 : vector<1x8x32xf32> to vector<8x32xf32>
    %8 = arith.truncf %7 : vector<8x32xf32> to vector<8x32xbf16>
    %c0_8 = arith.constant 0 : index
    %c0_9 = arith.constant 0 : index
    %9 = vector.load %arg6[%c0_8, %c0_9] : memref<32x192xbf16, #tpu.memory_space<vmem>>, vector<32x192xbf16>
    %c0_10 = arith.constant 0 : index
    %c0_11 = arith.constant 0 : index
    %10 = vector.load %arg7[%c0_10, %c0_11] : memref<64x32xbf16, #tpu.memory_space<vmem>>, vector<64x32xbf16>
    %11 = vector.extract_strided_slice %9 {offsets = [0, 0], sizes = [32, 64], strides = [1, 1]} : vector<32x192xbf16> to vector<32x64xbf16>
    %cst = arith.constant dense<0.000000e+00> : vector<8x64xf32>
    %12 = tpu.matmul %2, %11, %cst {dimension_numbers = #tpu.dot_dimension_numbers<[1], [0], [0], [1], [0, 0, 1, 1], [], []>} : vector<8x32xbf16>, vector<32x64xbf16>, vector<8x64xf32> -> vector<8x64xf32>
    %13 = vector.extract_strided_slice %9 {offsets = [0, 64], sizes = [32, 64], strides = [1, 1]} : vector<32x192xbf16> to vector<32x64xbf16>
    %cst_12 = arith.constant dense<0.000000e+00> : vector<8x64xf32>
    %14 = tpu.matmul %5, %13, %cst_12 {dimension_numbers = #tpu.dot_dimension_numbers<[1], [0], [0], [1], [0, 0, 1, 1], [], []>} : vector<8x32xbf16>, vector<32x64xbf16>, vector<8x64xf32> -> vector<8x64xf32>
    %15 = vector.extract_strided_slice %9 {offsets = [0, 128], sizes = [32, 64], strides = [1, 1]} : vector<32x192xbf16> to vector<32x64xbf16>
    %cst_13 = arith.constant dense<0.000000e+00> : vector<8x64xf32>
    %16 = tpu.matmul %8, %15, %cst_13 {dimension_numbers = #tpu.dot_dimension_numbers<[1], [0], [0], [1], [0, 0, 1, 1], [], []>} : vector<8x32xbf16>, vector<32x64xbf16>, vector<8x64xf32> -> vector<8x64xf32>
    %cst_14 = arith.constant 2.500000e-01 : f32
    %17 = vector.broadcast %cst_14 : f32 to vector<8x64xf32>
    %18 = arith.mulf %12, %17 : vector<8x64xf32>
    %19 = arith.truncf %18 : vector<8x64xf32> to vector<8x64xbf16>
    %20 = arith.truncf %14 : vector<8x64xf32> to vector<8x64xbf16>
    %21 = arith.truncf %16 : vector<8x64xf32> to vector<8x64xbf16>
    %c0_15 = arith.constant 0 : index
    %c0_16 = arith.constant 0 : index
    %c0_17 = arith.constant 0 : index
    %22 = vector.load %arg5[%c0_15, %c0_16, %c0_17] : memref<1x1x8xf32, #tpu.memory_space<vmem>>, vector<1x1x8xf32>
    %23 = vector.shape_cast %22 : vector<1x1x8xf32> to vector<1x8xf32>
    %24 = vector.shape_cast %23 : vector<1x8xf32> to vector<1x8xf32>
    %25 = vector.broadcast %24 : vector<1x8xf32> to vector<8x8xf32>
    %26 = vector.extract_strided_slice %19 {offsets = [0, 0], sizes = [8, 16], strides = [1, 1]} : vector<8x64xbf16> to vector<8x16xbf16>
    %27 = vector.extract_strided_slice %20 {offsets = [0, 0], sizes = [8, 16], strides = [1, 1]} : vector<8x64xbf16> to vector<8x16xbf16>
    %28 = vector.extract_strided_slice %21 {offsets = [0, 0], sizes = [8, 16], strides = [1, 1]} : vector<8x64xbf16> to vector<8x16xbf16>
    %29 = tpu.transpose %27, [1, 0] : vector<8x16xbf16> -> vector<16x8xbf16>
    %cst_18 = arith.constant dense<0.000000e+00> : vector<8x8xf32>
    %30 = tpu.matmul %26, %29, %cst_18 {dimension_numbers = #tpu.dot_dimension_numbers<[1], [0], [0], [1], [0, 0, 1, 1], [], []>} : vector<8x16xbf16>, vector<16x8xbf16>, vector<8x8xf32> -> vector<8x8xf32>
    %31 = arith.addf %30, %25 : vector<8x8xf32>
    %cst_19 = arith.constant dense<0xFF800000> : vector<8xf32>
    %32 = vector.multi_reduction <maximumf>, %31, %cst_19 [1] : vector<8x8xf32> to vector<8xf32>
    %33 = vector.shape_cast %32 : vector<8xf32> to vector<8x1xf32>
    %34 = vector.broadcast %33 : vector<8x1xf32> to vector<8x8xf32>
    %35 = arith.subf %31, %34 : vector<8x8xf32>
    %36 = math.exp %35 : vector<8x8xf32>
    %cst_20 = arith.constant dense<0.000000e+00> : vector<8xf32>
    %37 = vector.multi_reduction <add>, %36, %cst_20 [1] : vector<8x8xf32> to vector<8xf32>
    %38 = vector.shape_cast %37 : vector<8xf32> to vector<8x1xf32>
    %39 = tpu.reciprocal %38 {approx = true} : vector<8x1xf32> -> vector<8x1xf32>
    %40 = vector.broadcast %39 : vector<8x1xf32> to vector<8x8xf32>
    %41 = arith.mulf %36, %40 : vector<8x8xf32>
    %42 = arith.truncf %41 : vector<8x8xf32> to vector<8x8xbf16>
    %cst_21 = arith.constant dense<0.000000e+00> : vector<8x16xf32>
    %43 = tpu.matmul %42, %28, %cst_21 {dimension_numbers = #tpu.dot_dimension_numbers<[1], [0], [0], [1], [0, 0, 1, 1], [], []>} : vector<8x8xbf16>, vector<8x16xbf16>, vector<8x16xf32> -> vector<8x16xf32>
    %44 = arith.truncf %43 : vector<8x16xf32> to vector<8x16xbf16>
    %45 = vector.extract_strided_slice %10 {offsets = [0, 0], sizes = [16, 32], strides = [1, 1]} : vector<64x32xbf16> to vector<16x32xbf16>
    %cst_22 = arith.constant dense<0.000000e+00> : vector<8x32xf32>
    %46 = tpu.matmul %44, %45, %cst_22 {dimension_numbers = #tpu.dot_dimension_numbers<[1], [0], [0], [1], [0, 0, 1, 1], [], []>} : vector<8x16xbf16>, vector<16x32xbf16>, vector<8x32xf32> -> vector<8x32xf32>
    %47 = arith.addf %1, %46 : vector<8x32xf32>
    %48 = vector.extract_strided_slice %19 {offsets = [0, 16], sizes = [8, 16], strides = [1, 1]} : vector<8x64xbf16> to vector<8x16xbf16>
    %49 = vector.extract_strided_slice %20 {offsets = [0, 16], sizes = [8, 16], strides = [1, 1]} : vector<8x64xbf16> to vector<8x16xbf16>
    %50 = vector.extract_strided_slice %21 {offsets = [0, 16], sizes = [8, 16], strides = [1, 1]} : vector<8x64xbf16> to vector<8x16xbf16>
    %51 = tpu.transpose %49, [1, 0] : vector<8x16xbf16> -> vector<16x8xbf16>
    %cst_23 = arith.constant dense<0.000000e+00> : vector<8x8xf32>
    %52 = tpu.matmul %48, %51, %cst_23 {dimension_numbers = #tpu.dot_dimension_numbers<[1], [0], [0], [1], [0, 0, 1, 1], [], []>} : vector<8x16xbf16>, vector<16x8xbf16>, vector<8x8xf32> -> vector<8x8xf32>
    %53 = arith.addf %52, %25 : vector<8x8xf32>
    %cst_24 = arith.constant dense<0xFF800000> : vector<8xf32>
    %54 = vector.multi_reduction <maximumf>, %53, %cst_24 [1] : vector<8x8xf32> to vector<8xf32>
    %55 = vector.shape_cast %54 : vector<8xf32> to vector<8x1xf32>
    %56 = vector.broadcast %55 : vector<8x1xf32> to vector<8x8xf32>
    %57 = arith.subf %53, %56 : vector<8x8xf32>
    %58 = math.exp %57 : vector<8x8xf32>
    %cst_25 = arith.constant dense<0.000000e+00> : vector<8xf32>
    %59 = vector.multi_reduction <add>, %58, %cst_25 [1] : vector<8x8xf32> to vector<8xf32>
    %60 = vector.shape_cast %59 : vector<8xf32> to vector<8x1xf32>
    %61 = tpu.reciprocal %60 {approx = true} : vector<8x1xf32> -> vector<8x1xf32>
    %62 = vector.broadcast %61 : vector<8x1xf32> to vector<8x8xf32>
    %63 = arith.mulf %58, %62 : vector<8x8xf32>
    %64 = arith.truncf %63 : vector<8x8xf32> to vector<8x8xbf16>
    %cst_26 = arith.constant dense<0.000000e+00> : vector<8x16xf32>
    %65 = tpu.matmul %64, %50, %cst_26 {dimension_numbers = #tpu.dot_dimension_numbers<[1], [0], [0], [1], [0, 0, 1, 1], [], []>} : vector<8x8xbf16>, vector<8x16xbf16>, vector<8x16xf32> -> vector<8x16xf32>
    %66 = arith.truncf %65 : vector<8x16xf32> to vector<8x16xbf16>
    %67 = vector.extract_strided_slice %10 {offsets = [16, 0], sizes = [16, 32], strides = [1, 1]} : vector<64x32xbf16> to vector<16x32xbf16>
    %cst_27 = arith.constant dense<0.000000e+00> : vector<8x32xf32>
    %68 = tpu.matmul %66, %67, %cst_27 {dimension_numbers = #tpu.dot_dimension_numbers<[1], [0], [0], [1], [0, 0, 1, 1], [], []>} : vector<8x16xbf16>, vector<16x32xbf16>, vector<8x32xf32> -> vector<8x32xf32>
    %69 = arith.addf %47, %68 : vector<8x32xf32>
    %70 = vector.extract_strided_slice %19 {offsets = [0, 32], sizes = [8, 16], strides = [1, 1]} : vector<8x64xbf16> to vector<8x16xbf16>
    %71 = vector.extract_strided_slice %20 {offsets = [0, 32], sizes = [8, 16], strides = [1, 1]} : vector<8x64xbf16> to vector<8x16xbf16>
    %72 = vector.extract_strided_slice %21 {offsets = [0, 32], sizes = [8, 16], strides = [1, 1]} : vector<8x64xbf16> to vector<8x16xbf16>
    %73 = tpu.transpose %71, [1, 0] : vector<8x16xbf16> -> vector<16x8xbf16>
    %cst_28 = arith.constant dense<0.000000e+00> : vector<8x8xf32>
    %74 = tpu.matmul %70, %73, %cst_28 {dimension_numbers = #tpu.dot_dimension_numbers<[1], [0], [0], [1], [0, 0, 1, 1], [], []>} : vector<8x16xbf16>, vector<16x8xbf16>, vector<8x8xf32> -> vector<8x8xf32>
    %75 = arith.addf %74, %25 : vector<8x8xf32>
    %cst_29 = arith.constant dense<0xFF800000> : vector<8xf32>
    %76 = vector.multi_reduction <maximumf>, %75, %cst_29 [1] : vector<8x8xf32> to vector<8xf32>
    %77 = vector.shape_cast %76 : vector<8xf32> to vector<8x1xf32>
    %78 = vector.broadcast %77 : vector<8x1xf32> to vector<8x8xf32>
    %79 = arith.subf %75, %78 : vector<8x8xf32>
    %80 = math.exp %79 : vector<8x8xf32>
    %cst_30 = arith.constant dense<0.000000e+00> : vector<8xf32>
    %81 = vector.multi_reduction <add>, %80, %cst_30 [1] : vector<8x8xf32> to vector<8xf32>
    %82 = vector.shape_cast %81 : vector<8xf32> to vector<8x1xf32>
    %83 = tpu.reciprocal %82 {approx = true} : vector<8x1xf32> -> vector<8x1xf32>
    %84 = vector.broadcast %83 : vector<8x1xf32> to vector<8x8xf32>
    %85 = arith.mulf %80, %84 : vector<8x8xf32>
    %86 = arith.truncf %85 : vector<8x8xf32> to vector<8x8xbf16>
    %cst_31 = arith.constant dense<0.000000e+00> : vector<8x16xf32>
    %87 = tpu.matmul %86, %72, %cst_31 {dimension_numbers = #tpu.dot_dimension_numbers<[1], [0], [0], [1], [0, 0, 1, 1], [], []>} : vector<8x8xbf16>, vector<8x16xbf16>, vector<8x16xf32> -> vector<8x16xf32>
    %88 = arith.truncf %87 : vector<8x16xf32> to vector<8x16xbf16>
    %89 = vector.extract_strided_slice %10 {offsets = [32, 0], sizes = [16, 32], strides = [1, 1]} : vector<64x32xbf16> to vector<16x32xbf16>
    %cst_32 = arith.constant dense<0.000000e+00> : vector<8x32xf32>
    %90 = tpu.matmul %88, %89, %cst_32 {dimension_numbers = #tpu.dot_dimension_numbers<[1], [0], [0], [1], [0, 0, 1, 1], [], []>} : vector<8x16xbf16>, vector<16x32xbf16>, vector<8x32xf32> -> vector<8x32xf32>
    %91 = arith.addf %69, %90 : vector<8x32xf32>
    %92 = vector.extract_strided_slice %19 {offsets = [0, 48], sizes = [8, 16], strides = [1, 1]} : vector<8x64xbf16> to vector<8x16xbf16>
    %93 = vector.extract_strided_slice %20 {offsets = [0, 48], sizes = [8, 16], strides = [1, 1]} : vector<8x64xbf16> to vector<8x16xbf16>
    %94 = vector.extract_strided_slice %21 {offsets = [0, 48], sizes = [8, 16], strides = [1, 1]} : vector<8x64xbf16> to vector<8x16xbf16>
    %95 = tpu.transpose %93, [1, 0] : vector<8x16xbf16> -> vector<16x8xbf16>
    %cst_33 = arith.constant dense<0.000000e+00> : vector<8x8xf32>
    %96 = tpu.matmul %92, %95, %cst_33 {dimension_numbers = #tpu.dot_dimension_numbers<[1], [0], [0], [1], [0, 0, 1, 1], [], []>} : vector<8x16xbf16>, vector<16x8xbf16>, vector<8x8xf32> -> vector<8x8xf32>
    %97 = arith.addf %96, %25 : vector<8x8xf32>
    %cst_34 = arith.constant dense<0xFF800000> : vector<8xf32>
    %98 = vector.multi_reduction <maximumf>, %97, %cst_34 [1] : vector<8x8xf32> to vector<8xf32>
    %99 = vector.shape_cast %98 : vector<8xf32> to vector<8x1xf32>
    %100 = vector.broadcast %99 : vector<8x1xf32> to vector<8x8xf32>
    %101 = arith.subf %97, %100 : vector<8x8xf32>
    %102 = math.exp %101 : vector<8x8xf32>
    %cst_35 = arith.constant dense<0.000000e+00> : vector<8xf32>
    %103 = vector.multi_reduction <add>, %102, %cst_35 [1] : vector<8x8xf32> to vector<8xf32>
    %104 = vector.shape_cast %103 : vector<8xf32> to vector<8x1xf32>
    %105 = tpu.reciprocal %104 {approx = true} : vector<8x1xf32> -> vector<8x1xf32>
    %106 = vector.broadcast %105 : vector<8x1xf32> to vector<8x8xf32>
    %107 = arith.mulf %102, %106 : vector<8x8xf32>
    %108 = arith.truncf %107 : vector<8x8xf32> to vector<8x8xbf16>
    %cst_36 = arith.constant dense<0.000000e+00> : vector<8x16xf32>
    %109 = tpu.matmul %108, %94, %cst_36 {dimension_numbers = #tpu.dot_dimension_numbers<[1], [0], [0], [1], [0, 0, 1, 1], [], []>} : vector<8x8xbf16>, vector<8x16xbf16>, vector<8x16xf32> -> vector<8x16xf32>
    %110 = arith.truncf %109 : vector<8x16xf32> to vector<8x16xbf16>
    %111 = vector.extract_strided_slice %10 {offsets = [48, 0], sizes = [16, 32], strides = [1, 1]} : vector<64x32xbf16> to vector<16x32xbf16>
    %cst_37 = arith.constant dense<0.000000e+00> : vector<8x32xf32>
    %112 = tpu.matmul %110, %111, %cst_37 {dimension_numbers = #tpu.dot_dimension_numbers<[1], [0], [0], [1], [0, 0, 1, 1], [], []>} : vector<8x16xbf16>, vector<16x32xbf16>, vector<8x32xf32> -> vector<8x32xf32>
    %113 = arith.addf %91, %112 : vector<8x32xf32>
    %cst_38 = arith.constant dense<0.000000e+00> : vector<8xf32>
    %114 = vector.multi_reduction <add>, %113, %cst_38 [1] : vector<8x32xf32> to vector<8xf32>
    %115 = vector.shape_cast %114 : vector<8xf32> to vector<8x1xf32>
    %cst_39 = arith.constant 3.200000e+01 : f32
    %116 = vector.broadcast %cst_39 : f32 to vector<8x1xf32>
    %117 = arith.divf %115, %116 : vector<8x1xf32>
    %118 = vector.broadcast %117 : vector<8x1xf32> to vector<8x32xf32>
    %119 = arith.subf %113, %118 : vector<8x32xf32>
    %120 = arith.mulf %119, %119 : vector<8x32xf32>
    %cst_40 = arith.constant dense<0.000000e+00> : vector<8xf32>
    %121 = vector.multi_reduction <add>, %120, %cst_40 [1] : vector<8x32xf32> to vector<8xf32>
    %122 = vector.shape_cast %121 : vector<8xf32> to vector<8x1xf32>
    %cst_41 = arith.constant 3.200000e+01 : f32
    %123 = vector.broadcast %cst_41 : f32 to vector<8x1xf32>
    %124 = arith.divf %122, %123 : vector<8x1xf32>
    %125 = vector.broadcast %117 : vector<8x1xf32> to vector<8x32xf32>
    %126 = arith.subf %113, %125 : vector<8x32xf32>
    %cst_42 = arith.constant 9.99999974E-6 : f32
    %127 = vector.broadcast %cst_42 : f32 to vector<8x1xf32>
    %128 = arith.addf %124, %127 : vector<8x1xf32>
    %129 = math.rsqrt %128 : vector<8x1xf32>
    %130 = vector.broadcast %129 : vector<8x1xf32> to vector<8x32xf32>
    %131 = arith.mulf %126, %130 : vector<8x32xf32>
    %c0_43 = arith.constant 0 : index
    %c0_44 = arith.constant 0 : index
    %132 = vector.load %arg8[%c0_43, %c0_44] : memref<1x32xf32, #tpu.memory_space<vmem>>, vector<1x32xf32>
    %133 = vector.broadcast %132 : vector<1x32xf32> to vector<8x32xf32>
    %134 = arith.mulf %131, %133 : vector<8x32xf32>
    %c0_45 = arith.constant 0 : index
    %c0_46 = arith.constant 0 : index
    %135 = vector.load %arg9[%c0_45, %c0_46] : memref<1x32xf32, #tpu.memory_space<vmem>>, vector<1x32xf32>
    %136 = vector.broadcast %135 : vector<1x32xf32> to vector<8x32xf32>
    %137 = arith.addf %134, %136 : vector<8x32xf32>
    %c0_47 = arith.constant 0 : index
    %c0_48 = arith.constant 0 : index
    %c0_49 = arith.constant 0 : index
    %138 = vector.load %arg10[%c0_47, %c0_48, %c0_49] : memref<1x8x32xf32, #tpu.memory_space<vmem>>, vector<1x8x32xf32>
    %139 = vector.shape_cast %138 : vector<1x8x32xf32> to vector<8x32xf32>
    %140 = vector.shape_cast %137 : vector<8x32xf32> to vector<1x8x32xf32>
    tpu.vector_store %arg10[%c0_47, %c0_48, %c0_49], %140 {strides = array<i32>} : memref<1x8x32xf32, #tpu.memory_space<vmem>>, vector<1x8x32xf32>,
    return
  }
  func.func @transform_0(%arg0: i32, %arg1: i32) -> (i32, i32, i32) {
    %c0_i32 = arith.constant 0 : i32
    %c0_i32_0 = arith.constant 0 : i32
    return %arg0, %arg1, %c0_i32 : i32, i32, i32
  }
  func.func @transform_1(%arg0: i32, %arg1: i32) -> (i32, i32, i32) {
    %c0_i32 = arith.constant 0 : i32
    %c0_i32_0 = arith.constant 0 : i32
    %c0_i32_1 = arith.constant 0 : i32
    return %arg0, %c0_i32, %c0_i32_0 : i32, i32, i32
  }
  func.func @transform_2(%arg0: i32, %arg1: i32) -> (i32, i32, i32) {
    %c0_i32 = arith.constant 0 : i32
    %c0_i32_0 = arith.constant 0 : i32
    %c0_i32_1 = arith.constant 0 : i32
    return %arg0, %c0_i32, %c0_i32_0 : i32, i32, i32
  }
  func.func @transform_3(%arg0: i32, %arg1: i32) -> (i32, i32, i32) {
    %c0_i32 = arith.constant 0 : i32
    %c0_i32_0 = arith.constant 0 : i32
    %c0_i32_1 = arith.constant 0 : i32
    return %arg0, %c0_i32, %c0_i32_0 : i32, i32, i32
  }
  func.func @transform_4(%arg0: i32, %arg1: i32) -> (i32, i32) {
    %c0_i32 = arith.constant 0 : i32
    %c0_i32_0 = arith.constant 0 : i32
    %c0_i32_1 = arith.constant 0 : i32
    return %c0_i32, %c0_i32_0 : i32, i32
  }
  func.func @transform_5(%arg0: i32, %arg1: i32) -> (i32, i32) {
    %c0_i32 = arith.constant 0 : i32
    %c0_i32_0 = arith.constant 0 : i32
    %c0_i32_1 = arith.constant 0 : i32
    return %c0_i32, %c0_i32_0 : i32, i32
  }
  func.func @transform_6(%arg0: i32, %arg1: i32) -> (i32, i32) {
    %c0_i32 = arith.constant 0 : i32
    %c0_i32_0 = arith.constant 0 : i32
    %c0_i32_1 = arith.constant 0 : i32
    return %c0_i32, %c0_i32_0 : i32, i32
  }
  func.func @transform_7(%arg0: i32, %arg1: i32) -> (i32, i32) {
    %c0_i32 = arith.constant 0 : i32
    %c0_i32_0 = arith.constant 0 : i32
    %c0_i32_1 = arith.constant 0 : i32
    return %c0_i32, %c0_i32_0 : i32, i32
  }
  func.func @transform_8(%arg0: i32, %arg1: i32) -> (i32, i32, i32) {
    %c0_i32 = arith.constant 0 : i32
    %c0_i32_0 = arith.constant 0 : i32
    return %arg0, %arg1, %c0_i32 : i32, i32, i32
  }
}

</mosaic_0001>

<bundles_post_ra>
// kernel: tpu_custom_call.1
= control target key start
LH: loop header
LB: loop body
LE: loop exit
PB: predicated region body
PF: predicated region fallthrough
CT: control target
= control target key end

     0   :  { %s2295_s0 = inlined_call_operand.vmem [shape: f32[2,8,32], index: 0, kind: input, shape index: {}]   ;;  %s2296_s1 = inlined_call_operand.hbm [shape: f32[2,8,32], index: 1, kind: input, shape index: {}]   ;;  %s2297_s2 = inlined_call_operand.hbm [shape: f32[2,8,32], index: 2, kind: input, shape index: {}]   ;;  %s2298_s3 = inlined_call_operand.vmem [shape: f32[2,1,8], index: 3, kind: input, shape index: {}]   ;;  %s2299_s4 = inlined_call_operand.vmem [shape: bf16[32,192], index: 4, kind: input, shape index: {}]   ;;  %s2300_s5 = inlined_call_operand.vmem [shape: bf16[64,32], index: 5, kind: input, shape index: {}]   ;;  %s2301_s6 = inlined_call_operand.vmem [shape: f32[1,32], index: 6, kind: input, shape index: {}]   ;;  %s2302_s7 = inlined_call_operand.vmem [shape: f32[1,32], index: 7, kind: input, shape index: {}]   ;;  %s2303_s8 = inlined_call_operand.hbm [shape: f32[2,8,32], index: 8, kind: output, shape index: {}]  }
   0x1   :  { %2310 = sst [smem:[#allocation13_spill]] %s2296_s1 }
   0x2   :  { %13 = vsyncpa [#allocation3], 0 }
   0x3   :  { %15 = vsyncpa [#allocation3 + $0x1], 0 }
   0x4   :  { %16 = vsyncpa [#allocation6], 0 }
   0x5   :  { %18 = vsyncpa [#allocation6 + $0x1], 0 }
   0x6   :  { %19 = vsyncpa [#allocation4], 0 }
   0x7   :  { %21 = vsyncpa [#allocation4 + $0x1], 0  ;;  %s1904_s27 = smov 0   ;;  %s1906_s28 = smov 0  }
   0x8   :  { %s1908_s29 = smov 0   ;;  %s1910_s30 = smov 0  }
   0x9   :  { %s1912_s9 = smov 0   ;;  %s1914_s10 = smov 0  }
   0xa LB: > { %2311 = sst [smem:[#allocation11_spill]] %s1844_s9  ;;  %s1416_s11 = sadd.s32 4294967295, %s1848_s10   ;;  %s1848_s10 = sphi %s1914_s10, %s27_s10   ;;  %s1844_s9 = sphi %s1912_s9, %s2330_s9   ;;  %s1840_s30 = sphi %s1910_s30, %s2329_s30   ;;  %s1836_s29 = sphi %s1908_s29, %s2333_s29   ;;  %s1832_s28 = sphi %s1906_s28, %s2332_s28   ;;  %s1828_s27 = sphi %s1904_s27, %s2331_s27  }
   0xb   : > { %s1417_s12 = sadd.s32 4294967294, %s1848_s10   ;;  %s39_s13 = sadd.s32 1, %s1844_s9 }
   0xc   : > { %s74_s14 = sadd.s32 1, %s1836_s29  ;;  %p41_p0 = scmp.ge.s32.totalorder %s39_s13, 2 }
   0xd   : > { %p81_p1 = scmp.ne.s32.totalorder %s1836_s29, %s1832_s28  ;;  %p82_p2 = scmp.eq.s32.totalorder %s1848_s10, 0 }
   0xe   : > { %p87_p3 = scmp.ne.s32.totalorder %s1832_s28, %s1828_s27  ;;  %s2335_s13 = smov (%p41_p0, %s39_s13), 0 }
   0xf   : > { %2312 = sst [smem:[#allocation12_spill]] %s2335_s13  ;;  %p1945_p4 = por %p82_p2, %p81_p1 }
  0x10   : > { %p88_p5 = scmp.eq.s32.totalorder %s1416_s11, 0  ;;  %s71_s16 = ssub.s32 %s1844_s9, %s2335_s13 }
  0x11   : > { %p249_p6 = scmp.eq.s32.totalorder %s1416_s11, 1  ;;  %p72_p7 = scmp.eq.s32.totalorder %s71_s16, 0 }
  0x12   : > { %p1951_p8 = por %p88_p5, %p87_p3  ;;  %p255_p10 = scmp.eq.s32.totalorder %s1417_s12, 1 }
  0x13   : > { %p1955_p9 = por %p249_p6, %p81_p1  ;;  %p1618_p13 = scmp.lt.s32.totalorder %s1848_s10, 2 }
  0x14   : > { %s2314_s17 = scalar_select %p1951_p8, 1, 0 }
  0x15   : > { %s2315_s18 = scalar_select %p1955_p9, 1, 0 }
  0x16   : > { %s1960_s19 = scalar_select %p72_p7, %s1836_s29, %s74_s14  }
  0x17   : > { %p1962_p11 = por %p255_p10, %p87_p3  ;;  %s1969_s21 = sand.u32 1, %s1836_s29  }
  0x18   : > { %s2304_s22 = sshll.u32 %s1969_s21, 3  ;;  %s2305_s23 = sshll.u32 %s1844_s9, 7 }
  0x19   : > { %s2316_s20 = scalar_select %p1962_p11, 1, 0 }
  0x1a   : > { %s2317_s1 = sld [smem:[#allocation13_spill]]  ;;  %s301_s11 = scalar_lea.vmem [#allocation2], %s2304_s22 }
  0x1b   : > { %s308_s12 = sshll.u32 %s301_s11, 4  ;;  %p1986_p0 = pnand %p1618_p13, %p1945_p4  ;;  %s1982_s12 = int_to_ptr.vmem [resolvable:$true] %s308_s12 }
  0x1c   : > { %s298_s16 = scalar_lea.sflag [#allocation3], %s1969_s21 }
  0x1d   : > { %p1704_p5 = pneg %p1986_p0 }
  0x20   : > { %s1978_s26 = scalar_lea.hbm %s2317_s1, %s2305_s23  ;;  %s1707_s15 = scalar_lea.hbm %s2317_s1, 256 }
  0x21   : > { %s1702_s24 = scalar_lea.hbm %s1978_s26, 128  ;;  %p1708_p4 = scmp.lt.u32.totalorder %s1978_s26, %s2317_s1 }
  0x22   : > { %p1703_p3 = scmp.ne.s32.totalorder %s1978_s26, %s1702_s24  ;;  %p1709_p10 = scmp.lt.u32.totalorder %s1707_s15, %s1702_s24 }
  0x23   : > { %p1711_p12 = scmp.lt.u32.totalorder %s1702_s24, %s1978_s26 }
  0x24   : > { %p1705_p6 = pnand %p1704_p5, %p1703_p3  ;;  %p1710_p13 = por %p1709_p10, %p1708_p4 }
  0x26   : > { %p1706_p7 = pneg %p1705_p6  ;;  %p1712_p1 = por %p1711_p12, %p1710_p13 }
  0x28   : > { %p1713_p2 = pnand %p1712_p1, %p1706_p7 }
  0x2a   : > { %1716 = shalt.err (!%p1713_p2)
}
  0x2b   : > { %s1717_s13 = scalar_lea.vmem %s1982_s12, 128  ;;  %s1850_s25 = smov [#allocation2]  }
  0x2c   : > { %p1718_p3 = scmp.ne.s32.totalorder %s1982_s12, %s1717_s13  ;;  %s1722_s11 = sshll.u32 %s1850_s25, 4  ;;  %s1723_s11 = int_to_ptr.vmem [resolvable:$false] %s1722_s11 }
  0x2d   : > { %s1724_s22 = scalar_lea.vmem %s1723_s11, 256  ;;  %p1725_p9 = scmp.lt.s32.totalorder %s1982_s12, %s1723_s11 }
  0x2e   : > { %p1720_p6 = pnand %p1718_p3, %p1704_p5  ;;  %p1726_p4 = scmp.lt.s32.totalorder %s1724_s22, %s1717_s13 }
  0x30   : > { %p1721_p11 = pneg %p1720_p6  ;;  %p1727_p10 = por %p1726_p4, %p1725_p9 }
  0x32   : > { %p1728_p12 = pnand %p1727_p10, %p1721_p11 }
  0x34   : > { %1731 = shalt.err (!%p1728_p12)
}
  0x35   : > { %1610 = dma.hbm_to_vmem [thread:$0]  (!%p1986_p0), %s1978_s26, 128, %s1982_s12, %s298_s16  }
  0x36   : > { %p2319_p1 = scmp.lt.s32.totalorder %s1848_s10, 3  ;;  %p2320_p2 = scmp.ge.s32.totalorder %s1848_s10, 1 }
  0x37   : > { %s2322_s13 = sshll.u32 %s1844_s9, 7  ;;  %s2323_s11 = sshll.u32 %s1969_s21, 3 }
  0x38   : > { %p2022_p7 = pnand %p2320_p2, %p2319_p1  ;;  %s2031_s25 = scalar_lea.hbm %s2297_s2, %s2322_s13 }
  0x39   : > { %s319_s22 = scalar_lea.vmem [#allocation5], %s2323_s11  ;;  %s316_s26 = scalar_lea.sflag [#allocation6], %s1969_s21 }
  0x3a   : > { %s2321_s23 = scalar_select %p2022_p7, 1, 0 }
  0x3b   : > { %s326_s1 = sshll.u32 %s319_s22, 4  ;;  %s1732_s12 = scalar_lea.hbm %s2031_s25, 128  ;;  %s327_s1 = int_to_ptr.vmem [resolvable:$true] %s326_s1 }
  0x3c   : > { %p1733_p9 = scmp.ne.s32.totalorder %s2031_s25, %s1732_s12  ;;  %s1737_s13 = scalar_lea.hbm %s2297_s2, 256 }
  0x3d   : > { %p1738_p3 = scmp.lt.u32.totalorder %s2031_s25, %s2297_s2  ;;  %p1739_p6 = scmp.lt.u32.totalorder %s1737_s13, %s1732_s12 }
  0x3e   : > { %p1735_p11 = pnand %p1733_p9, %p1704_p5  ;;  %p1741_p10 = scmp.lt.u32.totalorder %s1732_s12, %s2031_s25 }
  0x3f   : > { %p1740_p4 = por %p1739_p6, %p1738_p3 }
  0x40   : > { %p1736_p13 = pneg %p1735_p11 }
  0x41   : > { %p1742_p12 = por %p1741_p10, %p1740_p4 }
  0x43   : > { %p1743_p1 = pnand %p1742_p12, %p1736_p13 }
  0x45   : > { %1746 = shalt.err (!%p1743_p1)
}
  0x46   : > { %s1747_s21 = scalar_lea.vmem %s327_s1, 128  ;;  %s1851_s11 = smov [#allocation5]  }
  0x47   : > { %p1748_p2 = scmp.ne.s32.totalorder %s327_s1, %s1747_s21  ;;  %s1752_s9 = sshll.u32 %s1851_s11, 4  ;;  %s1753_s9 = int_to_ptr.vmem [resolvable:$false] %s1752_s9 }
  0x48   : > { %s1754_s22 = scalar_lea.vmem %s1753_s9, 256  ;;  %p1755_p8 = scmp.lt.s32.totalorder %s327_s1, %s1753_s9 }
  0x49   : > { %p1750_p9 = pnand %p1748_p2, %p1704_p5  ;;  %p1756_p7 = scmp.lt.s32.totalorder %s1754_s22, %s1747_s21 }
  0x4b   : > { %p1751_p11 = pneg %p1750_p9  ;;  %p1757_p3 = por %p1756_p7, %p1755_p8 }
  0x4d   : > { %p1758_p6 = pnand %p1757_p3, %p1751_p11 }
  0x4f   : > { %1761 = shalt.err (!%p1758_p6)
}
  0x50   : > { %1613 = dma.hbm_to_vmem [thread:$0]  (!%p1986_p0), %s2031_s25, 128, %s327_s1, %s316_s26  }
  0x51   : > { %p2324_p13 = scmp.ne.s32.totalorder %s2321_s23, 0 }
  0x52   : > { %s2058_s12 = sand.u32 (!%p2324_p13), 1, %s1832_s28   ;;  %p2325_p8 = scmp.ne.s32.totalorder (!%p2324_p13), %s2314_s17, 0 }
  0x53   : > { %341 = sbr.rel (%p2324_p13) target bundleno = 2809 (0xaf9), region = 52  ;;  %s2061_s16 = sshll.u32 (!%p2324_p13), %s2058_s12, 3 }
  0x54   : > { %s344_s13 = scalar_lea.sflag (!%p2324_p13), [#allocation3], %s2058_s12  ;;  %s347_s24 = scalar_lea.vmem (!%p2324_p13), [#allocation2], %s2061_s16 }
  0x5a   : > { %1815 = dma.done.wait (%p2325_p8), %s344_s13, 128  }
  0x5b   : > { %1817 = vsyncadd (%p2325_p8), %s344_s13, 4294967168  ;;  %s353_s1 = scalar_lea.sflag [#allocation6], %s2058_s12  ;;  %s356_s14 = scalar_lea.vmem [#allocation5], %s2061_s16 }
  0x5c   : > { %1819 = dma.done.wait (%p2325_p8), %s353_s1, 128  }
  0x5d   : > { %1821 = vsyncadd (%p2325_p8), %s353_s1, 4294967168  ;;  %p404_p0 = scmp.lt.s32.totalorder %s1840_s30, 1  ;;  %v1852_v0 = vmov 0.0   ;;  %vm1853_vm0 = vmmov 0   ;;  %v1674_v1 = vld [vmem:[%s2299_s4] ss:$8 sps:$4 sm:$0xff]  }
  0x5e   : > { %1500 = vmatprep.subr.bf16.mxu1 %v1852_v0  ;;  %1492 = vmatprep.subr.bf16.mxu0 %v1852_v0  ;;  %s1854_s9 = smov 64   ;;  %v1677_v2 = vld [vmem:[%s2299_s4 + $0x10] ss:$8 sps:$4 sm:$0xff]   ;;  %v1676_v5 = vld [vmem:[%s2299_s4 + $0x4] ss:$8 sps:$4 sm:$0xff]   ;;  %vm445_vm1 = vcmask 261120  }
  0x5f   : > { %1504 = vmatprep.mubr.msk.bf16.mxu1 %vm1853_vm0, %v1852_v0  ;;  %1496 = vmatprep.mubr.msk.bf16.mxu0 %vm1853_vm0, %v1852_v0  ;;  %s2083_s23 = scalar_select %p404_p0, %s1840_s30, 1  ;;  %v1679_v6 = vld [vmem:[%s2299_s4 + $0x14] ss:$8 sps:$4 sm:$0xff]   ;;  %v417_v8 = vld [vmem:[%s347_s24] sm:$0xff]  ;;  %vm600_vm2 = vcmask 130048   ;;  %vm647_vm3 = vcmask 64512  }
  0x60   : > { %489 = vrot.lane.b32.xlu0 %v1674_v1, %s1854_s9  ;;  %1493 = vmatpush3.bf16.msra.mxu0 %v1674_v1  ;;  %v418_v10 = vpack.c.bf16 %v417_v8, %v417_v8  ;;  %s1855_s24 = smov 112   ;;  %s1856_s15 = smov 96   ;;  %v419_v23 = vld [vmem:[%s356_s14] sm:$0xff]  ;;  %vm663_vm4 = vcmask 1043456   ;;  %v1680_v53 = vld [vmem:[%s2300_s5] sm:$0xff]  }
  0x61   : > { %s1428_s17 = sshll.u32 %s2083_s23, 3  ;;  %1494 = vmatprep.subr.bf16.mxu0 %v1852_v0  ;;  %v420_v24 = vpack.c.bf16 %v419_v23, %v419_v23  ;;  %s1857_s22 = smov 80  }
  0x62   : > { %s410_s11 = scalar_lea.vmem %s2295_s0, %s1428_s17  ;;  %s1456_s14 = sshll.u32 %s1840_s30, 7 }
  0x63   : > { %v2096_v3 = vld [vmem:[%s410_s11] sm:$0xff]  ;;  %s2245_s25 = scalar_lea.hbm %s2303_s8, %s1456_s14  ;;  %s1276_s17 = scalar_lea.sflag [#allocation4], %s2058_s12 }
  0x64   : > { %v416_v4 = vpack.c.bf16 %v2096_v3, %v2096_v3  ;;  %491 = vrot.lane.b32.xlu0 %v1677_v2, %s1854_s9  ;;  %1495 = vmatpush3.bf16.msra.mxu0 %v1677_v2  ;;  %s413_s9 = scalar_lea.vmem %s2298_s3, %s2083_s23  ;;  %s403_s23 = scalar_lea.vmem [#allocation7], %s2061_s16 }
  0x65   : > { %1508 = vmatprep.subr.bf16.mxu0 %v1852_v0  ;;  %v2145_v25 = vld [vmem:[%s413_s9] ss:$0 sm:$0xff]  ;;  %p2326_p7 = scmp.ne.s32.totalorder %s2315_s18, 0  ;;  %s1858_s30 = smov [#allocation7]  }
  0x66   : > { %s1766_s16 = sshll.u32 %s1858_s30, 4  ;;  %s1767_s16 = int_to_ptr.vmem [resolvable:$false] %s1766_s16 }
  0x67   : > { %1497 = vmatmul.mubr.msk.bf16.vlgmr.msra.gmra.mrb[0].mxu0 %vm445_vm1, %v416_v4 }
  0x68   : > { %1509 = vmatpush3.bf16.msra.mxu0 %v1676_v5  ;;  %1512 = vmatprep.mubr.msk.bf16.mxu0 %vm1853_vm0, %v1852_v0 }
  0x69   : > { %1510 = vmatprep.subr.bf16.mxu0 %v1852_v0 }
  0x6c   : > { %1511 = vmatpush3.bf16.msra.mxu0 %v1679_v6 }
  0x6d   : > { %1522 = vmatprep.subr.bf16.mxu0 %v1852_v0 }
  0x6f   : > { %1513 = vmatmul.mubr.msk.bf16.vlgmr.msra.gmra.mrb[4].mxu0 %vm445_vm1, %v420_v24 }
  0x70   : > { %1524 = vmatprep.mubr.msk.bf16.mxu0 %vm1853_vm0, %v1852_v0 }
  0xd2   : > { %v490_v7 = vpop.permute.xlu0 %489 }
  0xd3   : > { %1501 = vmatpush3.bf16.msra.mxu1 %v490_v7 }
  0xd4   : > { %1502 = vmatprep.subr.bf16.mxu1 %v1852_v0 }
  0xd6   : > { %v492_v9 = vpop.permute.xlu0 %491 }
  0xd7   : > { %1503 = vmatpush3.bf16.msra.mxu1 %v492_v9 }
  0xd8   : > { %1516 = vmatprep.subr.bf16.mxu1 %v1852_v0 }
  0xda   : > { %1505 = vmatmul.mubr.msk.bf16.vlgmr.msra.gmra.mrb[0].mxu1 %vm445_vm1, %v418_v10 }
  0xdb   : > { %1518 = vmatprep.mubr.msk.bf16.mxu1 %vm1853_vm0, %v1852_v0 }
 0x13a   : > { %v483_v11 = vpop.f32.mrb[0].mxu0 }
 0x13b   : > { %v1498_v12 = vpop.f32.mrb[1].mxu0  ;;  %v589_v20 = vmul.f32 0.25, %v483_v11 }
 0x13c   : > { %v486_v13 = vpop.f32.mrb[2].mxu0 }
 0x13d   : > { %v1499_v14 = vpop.f32.mrb[3].mxu0  ;;  %v2126_v22 = vpack.c.bf16 %v589_v20, %v589_v20 }
 0x142   : > { %v583_v37 = vpop.f32.mrb[4].mxu0 }
 0x143   : > { %v1514_v38 = vpop.f32.mrb[5].mxu0  ;;  %v2152_v40 = vpack.c.bf16 %v583_v37, %v583_v37 }
 0x144   : > { %v586_v39 = vpop.f32.mrb[6].mxu0 }
 0x145   : > { %v1515_v41 = vpop.f32.mrb[7].mxu0  ;;  %v665_v42 = vsel %vm663_vm4, %v2152_v40, 0 }
 0x146   : > { %1523 = vmatpush3.bf16.msra.mxu0 %v665_v42 }
 0x147   : > { %1534 = vmatprep.subr.bf16.mxu0 %v1852_v0 }
 0x1ad   : > { %v532_v15 = vpop.f32.mrb[0].mxu1 }
 0x1ae   : > { %v2119_v16 = vpack.c.bf16 %v532_v15, %v532_v15  ;;  %v1506_v17 = vpop.f32.mrb[1].mxu1 }
 0x1af   : > { %v535_v18 = vpop.f32.mrb[2].mxu1 }
 0x1b0   : > { %762 = vrot.lane.b32.xlu0 %v2119_v16, %s1855_s24  ;;  %v1507_v19 = vpop.f32.mrb[3].mxu1  ;;  %v605_v21 = vsel %vm600_vm2, %v2119_v16, 0 }
 0x1b1   : > { %1517 = vmatpush3.bf16.xpose.msra.mxu1 %v605_v21 }
 0x1b2   : > { %1528 = vmatprep.subr.bf16.mxu1 %v1852_v0 }
 0x1b4   : > { %924 = vrot.lane.b32.xlu0 %v2119_v16, %s1856_s15 }
 0x1b8   : > { %1519 = vmatmul.mubr.msk.bf16.vlgmr.msra.gmra.mrb[4].mxu1 %vm600_vm2, %v2126_v22  ;;  %922 = vrot.lane.b32.xlu0 %v2126_v22, %s1856_s15 }
 0x1b9   : > { %1530 = vmatprep.mubr.msk.bf16.mxu1 %vm1853_vm0, %v1852_v0  ;;  %1529 = vmatpush3.bf16.msra.mxu1 %v1680_v53 }
 0x1ba   : > { %1540 = vmatprep.subr.bf16.mxu1 %v1852_v0 }
 0x222   : > { %v763_v46 = vpop.permute.xlu0 %762 }
 0x223   : > { %v768_v48 = vsel %vm600_vm2, %v763_v46, 0 }
 0x226   : > { %v925_v49 = vpop.permute.xlu0 %924 }
 0x227   : > { %v930_v51 = vsel %vm600_vm2, %v925_v49, 0 }
 0x22a   : > { %v923_v52 = vpop.permute.xlu0 %922 }
 0x28b   : > { %v641_v26 = vpop.f32.mrb[4].mxu1 }
 0x28c   : > { %v642_v27 = vadd.f32 %v2145_v25, %v641_v26  ;;  %v1520_v28 = vpop.f32.mrb[5].mxu1 }
 0x28d   : > { %v644_v29 = vpop.f32.mrb[6].mxu1 }
 0x28e   : > { %v1521_v30 = vpop.f32.mrb[7].mxu1  ;;  %v648_v31 = vsel %vm647_vm3, %v642_v27, -inf }
 0x28f   : > { %649 = vmax.xlane.f32.xlu1 %v648_v31 }
 0x31c   : > { %v650_v32 = vpop.xlane.xlu1 %649 }
 0x31d   : > { %v651_v33 = vsub.f32 %v642_v27, %v650_v32 }
 0x31f   : > { %v652_v34 = vmul.f32 1.442695, %v651_v33 }
 0x321   : > { %1684 = vpow2.f32 %v652_v34 }
 0x32b   : > { %v1685_v35 = vpop.eup %1684 }
 0x32c   : > { %v654_v36 = vsel %vm647_vm3, %v1685_v35, 0.0 }
 0x32d   : > { %655 = vadd.xlane.f32.xlu1 %v654_v36 }
 0x33e   : > { %759 = vrot.lane.b32.xlu1 %v2126_v22, %s1855_s24 }
 0x3ba   : > { %v656_v43 = vpop.xlane.xlu1 %655 }
 0x3bb   : > { %1686 = vrcp.f32 %v656_v43 }
 0x3be   : > { %v760_v50 = vpop.permute.xlu1 %759 }
 0x3c5   : > { %v1687_v44 = vpop.eup %1686 }
 0x3c6   : > { %v658_v45 = vmul.f32 %v1687_v44, %v1685_v35  ;;  %v1681_v35 = vld [vmem:[%s2300_s5 + $0x8] sm:$0xff]  }
 0x3c8   : > { %v659_v47 = vpack.c.bf16 %v658_v45, %v658_v45 }
 0x3ca   : > { %1525 = vmatmul.mubr.msk.bf16.vlgmr.msra.gmra.mrb[8].mxu0 %vm647_vm3, %v659_v47 }
 0x3cb   : > { %1535 = vmatpush3.bf16.xpose.msra.mxu0 %v768_v48  ;;  %1536 = vmatprep.mubr.msk.bf16.mxu0 %vm1853_vm0, %v1852_v0  ;;  %v1682_v48 = vld [vmem:[%s2300_s5 + $0x10] sm:$0xff]  }
 0x3cc   : > { %1552 = vmatprep.subr.bf16.mxu0 %v1852_v0 }
 0x3d2   : > { %1537 = vmatmul.mubr.msk.bf16.vlgmr.msra.gmra.mrb[12].mxu0 %vm600_vm2, %v760_v50 }
 0x3d3   : > { %1553 = vmatpush3.bf16.xpose.msra.mxu0 %v930_v51  ;;  %1554 = vmatprep.mubr.msk.bf16.mxu0 %vm1853_vm0, %v1852_v0 }
 0x3d4   : > { %1558 = vmatprep.subr.bf16.mxu0 %v1852_v0 }
 0x3da   : > { %1555 = vmatmul.mubr.msk.bf16.vlgmr.msra.gmra.mrb[16].mxu0 %vm600_vm2, %v923_v52 }
 0x3db   : > { %1560 = vmatprep.mubr.msk.bf16.mxu0 %vm1853_vm0, %v1852_v0 }
 0x49d   : > { %v701_v54 = vpop.f32.mrb[8].mxu0 }
 0x49e   : > { %v707_v55 = vpack.c.bf16 %v701_v54, %v701_v54  ;;  %v1526_v56 = vpop.f32.mrb[9].mxu0 }
 0x49f   : > { %v704_v57 = vpop.f32.mrb[10].mxu0 }
 0x4a0   : > { %v1527_v58 = vpop.f32.mrb[11].mxu0  ;;  %1531 = vmatmul.mubr.msk.bf16.vlgmr.msra.gmra.mrb[8].mxu1 %vm600_vm2, %v707_v55 }
 0x4a1   : > { %1542 = vmatprep.mubr.msk.bf16.mxu1 %vm1853_vm0, %v1852_v0 }
 0x4a5   : > { %v804_v59 = vpop.f32.mrb[12].mxu0 }
 0x4a6   : > { %v1538_v60 = vpop.f32.mrb[13].mxu0  ;;  %v805_v7 = vadd.f32 %v2145_v25, %v804_v59 }
 0x4a7   : > { %v807_v61 = vpop.f32.mrb[14].mxu0 }
 0x4a8   : > { %v1539_v62 = vpop.f32.mrb[15].mxu0  ;;  %v810_v8 = vsel %vm647_vm3, %v805_v7, -inf }
 0x4ad   : > { %v966_v63 = vpop.f32.mrb[16].mxu0 }
 0x4ae   : > { %v967_v1 = vadd.f32 %v2145_v25, %v966_v63  ;;  %v1556_v2 = vpop.f32.mrb[17].mxu0  ;;  %v1683_v63 = vld [vmem:[%s2300_s5 + $0x18] sm:$0xff]  }
 0x4af   : > { %v969_v4 = vpop.f32.mrb[18].mxu0 }
 0x4b0   : > { %v1557_v5 = vpop.f32.mrb[19].mxu0  ;;  %v972_v6 = vsel %vm647_vm3, %v967_v1, -inf }
 0x4b1   : > { %973 = vmax.xlane.f32.xlu0 %v972_v6 }
 0x4c7   : > { %984 = vrot.lane.b32.xlu0 %v2152_v40, %s1856_s15 }
 0x4cb   : > { %1083 = vrot.lane.b32.xlu0 %v2126_v22, %s1857_s22 }
 0x4ea   : > { %811 = vmax.xlane.f32.xlu0 %v810_v8 }
 0x500   : > { %823 = vrot.lane.b32.xlu0 %v2152_v40, %s1855_s24  ;;  %s1768_s24 = scalar_lea.vmem %s1767_s16, 256 }
 0x53e   : > { %v974_v9 = vpop.xlane.xlu0 %973 }
 0x53f   : > { %v975_v10 = vsub.f32 %v967_v1, %v974_v9 }
 0x541   : > { %v976_v11 = vmul.f32 1.442695, %v975_v10 }
 0x542   : > { %v985_v12 = vpop.permute.xlu0 %984 }
 0x543   : > { %1688 = vpow2.f32 %v976_v11  ;;  %v990_v13 = vsel %vm663_vm4, %v985_v12, 0 }
 0x544   : > { %1559 = vmatpush3.bf16.msra.mxu0 %v990_v13 }
 0x545   : > { %1570 = vmatprep.subr.bf16.mxu0 %v1852_v0 }
 0x546   : > { %v1084_v17 = vpop.permute.xlu0 %1083 }
 0x54d   : > { %v1689_v14 = vpop.eup %1688 }
 0x54e   : > { %v978_v15 = vsel %vm647_vm3, %v1689_v14, 0.0 }
 0x54f   : > { %979 = vadd.xlane.f32.xlu1 %v978_v15 }
 0x560   : > { %1085 = vrot.lane.b32.xlu1 %v2119_v16, %s1857_s22 }
 0x577   : > { %v812_v18 = vpop.xlane.xlu0 %811 }
 0x578   : > { %v813_v19 = vsub.f32 %v805_v7, %v812_v18 }
 0x57a   : > { %v814_v20 = vmul.f32 1.442695, %v813_v19 }
 0x57b   : > { %v824_v21 = vpop.permute.xlu0 %823 }
 0x57c   : > { %1690 = vpow2.f32 %v814_v20  ;;  %v829_v22 = vsel %vm663_vm4, %v824_v21, 0  ;;  %v1453_v21 = vld [vmem:[%s2301_s6] ss:$0 sm:$0xff] }
 0x57d   : > { %1541 = vmatpush3.bf16.msra.mxu1 %v829_v22 }
 0x57e   : > { %1546 = vmatprep.subr.bf16.mxu1 %v1852_v0 }
 0x586   : > { %v1691_v23 = vpop.eup %1690 }
 0x587   : > { %v816_v24 = vsel %vm647_vm3, %v1691_v23, 0.0 }
 0x588   : > { %817 = vadd.xlane.f32.xlu1 %v816_v24 }
 0x5dc   : > { %v980_v26 = vpop.xlane.xlu1 %979 }
 0x5dd   : > { %1692 = vrcp.f32 %v980_v26 }
 0x5e0   : > { %v1086_v16 = vpop.permute.xlu1 %1085 }
 0x5e1   : > { %v1091_v30 = vsel %vm600_vm2, %v1086_v16, 0 }
 0x5e7   : > { %v1693_v27 = vpop.eup %1692 }
 0x5e8   : > { %v982_v28 = vmul.f32 %v1693_v27, %v1689_v14 }
 0x5ea   : > { %v983_v29 = vpack.c.bf16 %v982_v28, %v982_v28 }
 0x5ec   : > { %1561 = vmatmul.mubr.msk.bf16.vlgmr.msra.gmra.mrb[20].mxu0 %vm647_vm3, %v983_v29 }
 0x5ed   : > { %1571 = vmatpush3.bf16.xpose.msra.mxu0 %v1091_v30  ;;  %1572 = vmatprep.mubr.msk.bf16.mxu0 %vm1853_vm0, %v1852_v0 }
 0x5f4   : > { %1573 = vmatmul.mubr.msk.bf16.vlgmr.msra.gmra.mrb[24].mxu0 %vm600_vm2, %v1084_v17 }
 0x615   : > { %v818_v31 = vpop.xlane.xlu1 %817 }
 0x616   : > { %1694 = vrcp.f32 %v818_v31 }
 0x620   : > { %v1695_v32 = vpop.eup %1694 }
 0x621   : > { %v820_v33 = vmul.f32 %v1695_v32, %v1691_v23  ;;  %v1454_v23 = vld [vmem:[%s2302_s7] ss:$0 sm:$0xff] }
 0x623   : > { %v821_v34 = vpack.c.bf16 %v820_v33, %v820_v33 }
 0x625   : > { %1543 = vmatmul.mubr.msk.bf16.vlgmr.msra.gmra.mrb[12].mxu1 %vm647_vm3, %v821_v34 }
 0x626   : > { %1548 = vmatprep.mubr.msk.bf16.mxu1 %vm1853_vm0, %v1852_v0  ;;  %1547 = vmatpush3.bf16.msra.mxu1 %v1681_v35 }
 0x627   : > { %1564 = vmatprep.subr.bf16.mxu1 %v1852_v0 }
 0x6bf   : > { %v1026_v36 = vpop.f32.mrb[20].mxu0 }
 0x6c0   : > { %v1562_v37 = vpop.f32.mrb[21].mxu0 }
 0x6c1   : > { %v1029_v38 = vpop.f32.mrb[22].mxu0 }
 0x6c2   : > { %v1563_v39 = vpop.f32.mrb[23].mxu0 }
 0x6c7   : > { %v1127_v41 = vpop.f32.mrb[24].mxu0 }
 0x6c8   : > { %v1128_v42 = vadd.f32 %v2145_v25, %v1127_v41  ;;  %v1574_v43 = vpop.f32.mrb[25].mxu0  ;;  %v1032_v25 = vpack.c.bf16 %v1026_v36, %v1026_v36 }
 0x6c9   : > { %v1130_v44 = vpop.f32.mrb[26].mxu0 }
 0x6ca   : > { %v1575_v45 = vpop.f32.mrb[27].mxu0  ;;  %v1133_v46 = vsel %vm647_vm3, %v1128_v42, -inf }
 0x6cb   : > { %1134 = vmax.xlane.f32.xlu1 %v1133_v46 }
 0x6f8   : > { %v865_v47 = vpop.f32.mrb[12].mxu1 }
 0x6f9   : > { %v871_v49 = vpack.c.bf16 %v865_v47, %v865_v47  ;;  %v1544_v50 = vpop.f32.mrb[13].mxu1 }
 0x6fa   : > { %v868_v51 = vpop.f32.mrb[14].mxu1 }
 0x6fb   : > { %v1545_v52 = vpop.f32.mrb[15].mxu1  ;;  %1549 = vmatmul.mubr.msk.bf16.vlgmr.msra.gmra.mrb[8].mxu1 %vm600_vm2, %v871_v49 }
 0x6fc   : > { %1565 = vmatpush3.bf16.msra.mxu1 %v1682_v48  ;;  %1566 = vmatprep.mubr.msk.bf16.mxu1 %vm1853_vm0, %v1852_v0 }
 0x6fd   : > { %1576 = vmatprep.subr.bf16.mxu1 %v1852_v0 }
 0x707   : > { %1567 = vmatmul.mubr.msk.bf16.vlgmr.msra.gmra.mrb[8].mxu1 %vm600_vm2, %v1032_v25 }
 0x708   : > { %1578 = vmatprep.mubr.msk.bf16.mxu1 %vm1853_vm0, %v1852_v0 }
 0x758   : > { %v1135_v53 = vpop.xlane.xlu1 %1134 }
 0x759   : > { %v1136_v54 = vsub.f32 %v1128_v42, %v1135_v53 }
 0x75b   : > { %v1137_v55 = vmul.f32 1.442695, %v1136_v54 }
 0x75d   : > { %1696 = vpow2.f32 %v1137_v55 }
 0x767   : > { %v1697_v56 = vpop.eup %1696 }
 0x768   : > { %v1139_v57 = vsel %vm647_vm3, %v1697_v56, 0.0 }
 0x769   : > { %1140 = vadd.xlane.f32.xlu1 %v1139_v57 }
 0x77a   : > { %1145 = vrot.lane.b32.xlu1 %v2152_v40, %s1857_s22  ;;  %s1290_s22 = sshll.u32 %s403_s23, 4  ;;  %s2247_s22 = int_to_ptr.vmem [resolvable:$true] %s1290_s22 }
 0x77b   : > { %s1762_s26 = scalar_lea.vmem %s2247_s22, 128  ;;  %p1769_p12 = scmp.lt.s32.totalorder %s2247_s22, %s1767_s16 }
 0x77c   : > { %p1763_p5 = scmp.ne.s32.totalorder %s2247_s22, %s1762_s26  ;;  %p1770_p1 = scmp.lt.s32.totalorder %s1768_s24, %s1762_s26 }
 0x77e   : > { %p1764_p4 = pnand %p1763_p5, %p2326_p7  ;;  %p1771_p2 = por %p1770_p1, %p1769_p12 }
 0x780   : > { %p1765_p10 = pneg %p1764_p4 }
 0x782   : > { %p1772_p9 = pnand %p1771_p2, %p1765_p10 }
 0x7f6   : > { %v1141_v58 = vpop.xlane.xlu1 %1140 }
 0x7f7   : > { %1698 = vrcp.f32 %v1141_v58 }
 0x7fa   : > { %v1146_v59 = vpop.permute.xlu1 %1145 }
 0x7fb   : > { %v1151_v60 = vsel %vm663_vm4, %v1146_v59, 0 }
 0x7fc   : > { %1577 = vmatpush3.bf16.msra.mxu1 %v1151_v60 }
 0x7fd   : > { %1582 = vmatprep.subr.bf16.mxu1 %v1852_v0 }
 0x801   : > { %v1699_v61 = vpop.eup %1698 }
 0x802   : > { %v1143_v62 = vmul.f32 %v1699_v61, %v1697_v56 }
 0x804   : > { %v1144_v1 = vpack.c.bf16 %v1143_v62, %v1143_v62 }
 0x806   : > { %1579 = vmatmul.mubr.msk.bf16.vlgmr.msra.gmra.mrb[16].mxu1 %vm647_vm3, %v1144_v1 }
 0x807   : > { %1583 = vmatpush3.bf16.msra.mxu1 %v1683_v63  ;;  %1584 = vmatprep.mubr.msk.bf16.mxu1 %vm1853_vm0, %v1852_v0 }
 0x8d9   : > { %v1187_v40 = vpop.f32.mrb[16].mxu1 }
 0x8da   : > { %v1193_v2 = vpack.c.bf16 %v1187_v40, %v1187_v40  ;;  %v1580_v4 = vpop.f32.mrb[17].mxu1 }
 0x8db   : > { %v1190_v5 = vpop.f32.mrb[18].mxu1 }
 0x8dc   : > { %v1581_v6 = vpop.f32.mrb[19].mxu1  ;;  %1585 = vmatmul.mubr.msk.bf16.vlgmr.msra.gmra.mrb[8].mxu1 %vm600_vm2, %v1193_v2 }
 0x9af   : > { %v1237_v7 = vpop.f32.mrb[8].mxu1 }
 0x9b0   : > { %v1588_v8 = vadd.f32 %v1237_v7, %v2096_v3  ;;  %v1586_v9 = vpop.f32.mrb[9].mxu1 }
 0x9b1   : > { %v1240_v10 = vpop.f32.mrb[10].mxu1 }
 0x9b2   : > { %v1587_v11 = vpop.f32.mrb[11].mxu1  ;;  %v1244_v12 = vsel %vm445_vm1, %v1588_v8, 0.0 }
 0x9b3   : > { %1245 = vadd.xlane.f32.xlu0 %v1244_v12 }
 0xa40   : > { %v1246_v13 = vpop.xlane.xlu0 %1245 }
 0xa41   : > { %v1248_v0 = vmul.f32 0.03125, %v1246_v13 }
 0xa43   : > { %v1249_v14 = vsub.f32 %v1588_v8, %v1248_v0 }
 0xa45   : > { %v1250_v15 = vmul.f32 %v1249_v14, %v1249_v14 }
 0xa47   : > { %v1251_v17 = vsel %vm445_vm1, %v1250_v15, 0.0 }
 0xa48   : > { %1252 = vadd.xlane.f32.xlu1 %v1251_v17 }
 0xad5   : > { %v1253_v18 = vpop.xlane.xlu1 %1252 }
 0xad6   : > { %v1254_v19 = vmul.f32 0.03125, %v1253_v18 }
 0xad8   : > { %v1255_v20 = vadd.f32 1e-05, %v1254_v19 }
 0xada   : > { %1700 = vrsqrt.f32 %v1255_v20 }
 0xae4   : > { %v1701_v3 = vpop.eup %1700 }
 0xae5   : > { %v1257_v22 = vmul.f32 %v1701_v3, %v1249_v14 }
 0xae7   : > { %v1265_v24 = vmul.f32 %v1453_v21, %v1257_v22 }
 0xae9   : > { %v1273_v26 = vadd.f32 %v1454_v23, %v1265_v24 }
 0xaeb   : > { %1274 = vst.msk [vmem:[%s403_s23] sm:$0xff] %vm445_vm1, %v1273_v26 }
 0xaec   : > { %1775 = shalt.err (!%p1772_p9)
}
 0xaed   : > { %s1776_s12 = scalar_lea.hbm %s2245_s25, 128  ;;  %s1780_s11 = scalar_lea.hbm %s2303_s8, 256 }
 0xaee   : > { %p1777_p11 = scmp.ne.s32.totalorder %s2245_s25, %s1776_s12  ;;  %p1781_p13 = scmp.lt.u32.totalorder %s2245_s25, %s2303_s8 }
 0xaef   : > { %p1782_p8 = scmp.lt.u32.totalorder %s1780_s11, %s1776_s12  ;;  %p1784_p5 = scmp.lt.u32.totalorder %s1776_s12, %s2245_s25 }
 0xaf0   : > { %p1778_p3 = pnand %p1777_p11, %p2326_p7 }
 0xaf1   : > { %p1783_p0 = por %p1782_p8, %p1781_p13 }
 0xaf2   : > { %p1779_p6 = pneg %p1778_p3 }
 0xaf3   : > { %p1785_p4 = por %p1784_p5, %p1783_p0 }
 0xaf5   : > { %p1786_p10 = pnand %p1785_p4, %p1779_p6 }
 0xaf7   : > { %1789 = shalt.err (!%p1786_p10)
}
 0xaf8   : > { %1605 = dma.vmem_to_hbm [thread:$0]  (%p2326_p7), %s2247_s22, 128, %s2245_s25, %s1276_s17  }
 0xaf9 PF: > { %s1302_s23 = sand.u32 1, %s1828_s27   ;;  %p2327_p12 = scmp.ne.s32.totalorder %s2316_s20, 0 }
 0xafa   : > { %p2328_p1 = scmp.ge.s32.totalorder %s1848_s10, 2  ;;  %s1303_s13 = scalar_lea.sflag [#allocation4], %s1302_s23 }
 0xafc   : > { %p1615_p2 = pnand %p2328_p1, %p2327_p12 }
 0xafe   : > { %1823 = dma.done.wait (!%p1615_p2), %s1303_s13, 128  }
 0xaff   : > { %1825 = vsyncadd (!%p1615_p2), %s1303_s13, 4294967168  ;;  %s27_s10 = sadd.s32 1, %s1848_s10   ;;  %s2329_s30 = sld [smem:[#allocation11_spill]] }
 0xb00   : > { %p24_p9 = scmp.ge.s32.totalorder %s27_s10, 4   ;;  %s2330_s9 = sld [smem:[#allocation12_spill]] }
 0xb01   : > { %s2331_s27 = smov %s1832_s28  ;;  %s2332_s28 = smov %s1836_s29 }
 0xb02   : > { %s2333_s29 = smov %s1960_s19  ;;  %26 = sbr.rel (!%p24_p9) target bundleno = 10 (0xa), region = 116 }
 0xb09   :  { %1308 = vsyncpa [#allocation3], 1 }
 0xb0a   :  { %1310 = vsyncpa [#allocation3 + $0x1], 1 }
 0xb0b   :  { %1311 = vsyncpa [#allocation6], 1 }
 0xb0c   :  { %1313 = vsyncpa [#allocation6 + $0x1], 1 }
 0xb0d   :  { %1314 = vsyncpa [#allocation4], 1 }
 0xb0e   :  { %1316 = vsyncpa [#allocation4 + $0x1], 1 }

</bundles_post_ra>
